<compile_context>
chip_gen: v5e
topology: v5e:2x2
jax: 0.10.0
libtpu: 0.0.40
codegen_flags: <defaults>
</compile_context>

<pallas_src>
import jax
import jax.numpy as jnp
from jax import lax
from jax.experimental import pallas as pl
from jax.experimental.pallas import tpu as pltpu

EPS = 1e-5  # nn.InstanceNorm2d default


def _make_convblock_kernel(K, Wp, H, W, Lpad, use_act):
    """Kernel factory closing over static shape parameters."""
    inv_n = 1.0 / float(H * W)      # InstanceNorm averages over valid pixels only

    def kernel(x_ref, w_ref, m_ref, o_ref):
        # x_ref : (1, Cin, Lin)    reflect-padded, W-flattened image (bf16/f32),
        #                          zero-padded tail (only feeds masked columns)
        # w_ref : (K*K, TC, Cin)   conv taps, tap-major
        # m_ref : (1, Lpad) f32    1.0 where the column is a real (h, w<W) pixel
        # o_ref : (1, TC, Lpad)    normalized + activated output
        xv = x_ref[0]                                      # (Cin, Lin)
        tc = o_ref.shape[1]

        # Conv as 9 accumulated matmuls over shifted flat views (MXU, f32 acc).
        acc = jnp.zeros((tc, Lpad), jnp.float32)
        for kh in range(K):
            for kw in range(K):
                d = kh * Wp + kw                           # static tap offset
                xs = xv[:, d:d + Lpad]                     # (Cin, Lpad) shifted view
                wt = w_ref[kh * K + kw]                    # (TC, Cin)
                acc = acc + jnp.dot(wt, xs,
                                    preferred_element_type=jnp.float32)

        # InstanceNorm2d(affine=False) over the H*W valid positions, f32 math.
        # One-pass stats: var = E[y^2] - mean^2.  (Conv bias would be cancelled
        # by the mean subtraction, so it was never added.)
        mask = m_ref[...]                                  # (1, Lpad)
        mean = jnp.sum(acc * mask, axis=1, keepdims=True) * inv_n
        ex2 = jnp.sum(acc * acc * mask, axis=1, keepdims=True) * inv_n
        var = jnp.maximum(ex2 - mean * mean, 0.0)
        y = (acc - mean) * lax.rsqrt(var + EPS)
        if use_act:
            y = jnp.maximum(y, 0.0)                        # ReLU
        o_ref[0] = y.astype(o_ref.dtype)

    return kernel


def conv_block_forward(x, weight, bias=None, *, K=3, pad=1, use_act=True,
                       compute_dtype=jnp.bfloat16, cout_tile=None):
    """x: (N, Cin, H, W) NCHW;  weight: (Cout, Cin, K, K).

    `bias` is accepted for API parity but ignored: InstanceNorm2d(affine=False)
    subtracts the per-channel mean, which cancels a per-channel conv bias.
    """
    del bias
    N, Cin, H, W = x.shape
    Cout = weight.shape[0]
    assert weight.shape == (Cout, Cin, K, K)
    assert 2 * pad == K - 1, "stride-1 'same' convolution assumed"

    Hp, Wp = H + 2 * pad, W + 2 * pad
    L = H * Wp                                   # valid output length per image
    Lpad = ((L + 127) // 128) * 128              # lane-dense output length
    d_max = (K - 1) * (Wp + 1)                   # max static tap offset
    Lin = ((d_max + Lpad + 127) // 128) * 128    # lane-dense input length

    # Reflect pad (cheap XLA glue), flatten spatial, zero-pad the tail.  The
    # zero tail is only ever read for masked (padding-column) output positions.
    xp = jnp.pad(x, ((0, 0), (0, 0), (pad, pad), (pad, pad)), mode="reflect")
    x_flat = xp.reshape(N, Cin, Hp * Wp)
    x_flat = jnp.pad(x_flat, ((0, 0), (0, 0), (0, Lin - Hp * Wp)))
    x_flat = x_flat.astype(compute_dtype)        # bf16 HBM stream, f32 accumulate

    # (Cout, Cin, K, K) -> (K*K, Cout, Cin), tap-major.
    w_taps = jnp.transpose(weight, (2, 3, 0, 1)).reshape(K * K, Cout, Cin)
    w_taps = w_taps.astype(compute_dtype)

    # Valid-column mask on the lane-padded flattened spatial axis: a column is
    # valid iff it is a real width position (w < W) AND below the true H*Wp.
    col = jnp.arange(Lpad, dtype=jnp.int32)
    mask = ((col % Wp < W) & (col < L)).astype(jnp.float32).reshape(1, Lpad)

    # Cout tiling (bounds the big output block / gives the pipeline overlap).
    TC = Cout if cout_tile is None else min(cout_tile, Cout)
    assert Cout % TC == 0 and (TC == Cout or TC % 8 == 0)
    CT = Cout // TC

    flops = 2 * N * H * W * Cin * K * K * Cout
    bytes_accessed = (int(x_flat.size) * x_flat.dtype.itemsize
                      + N * int(w_taps.size) * w_taps.dtype.itemsize
                      + N * Cout * Lpad * x.dtype.itemsize)

    out = pl.pallas_call(
        _make_convblock_kernel(K, Wp, H, W, Lpad, use_act),
        out_shape=jax.ShapeDtypeStruct((N, Cout, Lpad), x.dtype),
        grid_spec=pltpu.PrefetchScalarGridSpec(
            num_scalar_prefetch=0,
            grid=(N, CT),
            in_specs=[
                # Image block: index ignores the Cout axis -> resident in VMEM,
                # DMA'd once per image while the Cout tiles cycle.
                pl.BlockSpec((1, Cin, Lin), lambda n, j: (n, 0, 0)),
                pl.BlockSpec((K * K, TC, Cin), lambda n, j: (0, j, 0)),
                pl.BlockSpec((1, Lpad), lambda n, j: (0, 0)),
            ],
            out_specs=pl.BlockSpec((1, TC, Lpad), lambda n, j: (n, j, 0)),
        ),
        compiler_params=pltpu.CompilerParams(
            # Both axes are independent work -> megacore can split either.
            dimension_semantics=("parallel", "parallel"),
            # Safe on all generations (< v7x's 64 MiB physical VMEM); raise
            # toward ~96-120 MiB on v5e/v6e for bigger per-image blocks.
            vmem_limit_bytes=48 * 1024 * 1024,
        ),
        cost_estimate=pl.CostEstimate(
            flops=flops, transcendentals=N * Cout, bytes_accessed=bytes_accessed),
    )(x_flat, w_taps, mask)

    # (N, Cout, Lpad) -> (N, Cout, H, W): drop lane padding, then width padding.
    # Already NCHW: no transpose needed.
    return out[:, :, :L].reshape(N, Cout, H, Wp)[:, :, :, :W]


def conv_block_reference(x, weight, bias=None, *, K=3, pad=1, use_act=True,
                         compute_dtype=jnp.bfloat16):
    """Pure-JAX reference of the PyTorch forward (inputs rounded through the
    same compute dtype the kernel feeds the MXU, accumulation in f32)."""
    xp = jnp.pad(x, ((0, 0), (0, 0), (pad, pad), (pad, pad)), mode="reflect")
    xq = xp.astype(compute_dtype).astype(jnp.float32)
    wq = weight.astype(compute_dtype).astype(jnp.float32)
    y = lax.conv_general_dilated(
        xq, wq, window_strides=(1, 1), padding="VALID",
        dimension_numbers=("NCHW", "OIHW", "NCHW"))
    if bias is not None:
        y = y + bias.reshape(1, -1, 1, 1).astype(jnp.float32)
    mean = jnp.mean(y, axis=(2, 3), keepdims=True)
    var = jnp.mean((y - mean) ** 2, axis=(2, 3), keepdims=True)
    y = (y - mean) * lax.rsqrt(var + EPS)
    if use_act:
        y = jnp.maximum(y, 0.0)
    return y.astype(x.dtype)


if __name__ == "__main__":
    # ConvBlock(in_channels=4, out_channels=8, down=True, use_act=True,
    #           kernel_size=3, stride=1, padding=1)
    N, Cin, Cout, H, W, K, pad = 2, 4, 8, 16, 16, 3, 1

    key = jax.random.PRNGKey(0)
    kx, kw_, kb = jax.random.split(key, 3)
    x = jax.random.normal(kx, (N, Cin, H, W), dtype=jnp.float32)
    fan_in = Cin * K * K
    bound = 1.0 / (fan_in ** 0.5)
    weight = jax.random.uniform(kw_, (Cout, Cin, K, K), jnp.float32, -bound, bound)
    bias = jax.random.uniform(kb, (Cout,), jnp.float32, -bound, bound)

    out = conv_block_forward(x, weight, bias, K=K, pad=pad)
    out = jax.block_until_ready(out)

    # The reference INCLUDES the conv bias; the kernel drops it, so the match
    # below also validates that InstanceNorm cancels the bias exactly.
    ref = conv_block_reference(x, weight, bias, K=K, pad=pad)
    assert out.shape == (N, Cout, H, W)
    max_err = float(jnp.max(jnp.abs(out - ref)))
    assert jnp.allclose(out, ref, atol=2e-3, rtol=2e-3), (
        f"mismatch vs reference, max abs err={max_err}")

    print("KERNEL_OK")
</pallas_src>

<mosaic_0001>
module attributes {stable_mosaic.version = 11 : i64} {
  func.func @kernel(%arg0: i32, %arg1: i32, %arg2: memref<1x4x512xbf16, #tpu.memory_space<vmem>>, %arg3: memref<9x8x4xbf16, #tpu.memory_space<vmem>>, %arg4: memref<1x384xf32, #tpu.memory_space<vmem>>, %arg5: memref<1x8x384xf32, #tpu.memory_space<vmem>>) attributes {dimension_semantics = [#tpu.dimension_semantics<parallel>, #tpu.dimension_semantics<parallel>], iteration_bounds = array<i64: 2, 1>, scalar_prefetch = 0 : i64, scratch_operands = 0 : i64, tpu.core_type = #tpu.core_type<tc>, window_params = [{transform_indices = @transform_0, window_bounds = array<i64: 1, 4, 512>}, {transform_indices = @transform_1, window_bounds = array<i64: 9, 8, 4>}, {pipeline_mode = #tpu.pipeline_mode<synchronous>, transform_indices = @transform_2, window_bounds = array<i64: 1, 384>}, {transform_indices = @transform_3, window_bounds = array<i64: 1, 8, 384>}]} {
    %c0 = arith.constant 0 : index
    %c0_0 = arith.constant 0 : index
    %c0_1 = arith.constant 0 : index
    %0 = vector.load %arg2[%c0, %c0_0, %c0_1] : memref<1x4x512xbf16, #tpu.memory_space<vmem>>, vector<1x4x512xbf16>
    %1 = vector.shape_cast %0 : vector<1x4x512xbf16> to vector<4x512xbf16>
    %cst = arith.constant 0.000000e+00 : f32
    %2 = vector.broadcast %cst : f32 to vector<8x384xf32>
    %3 = vector.extract_strided_slice %1 {offsets = [0, 0], sizes = [4, 384], strides = [1, 1]} : vector<4x512xbf16> to vector<4x384xbf16>
    %c0_2 = arith.constant 0 : index
    %c0_3 = arith.constant 0 : index
    %c0_4 = arith.constant 0 : index
    %4 = vector.load %arg3[%c0_2, %c0_3, %c0_4] : memref<9x8x4xbf16, #tpu.memory_space<vmem>>, vector<1x8x4xbf16>
    %5 = vector.shape_cast %4 : vector<1x8x4xbf16> to vector<8x4xbf16>
    %cst_5 = arith.constant dense<0.000000e+00> : vector<8x384xf32>
    %6 = tpu.matmul %5, %3, %cst_5 {dimension_numbers = #tpu.dot_dimension_numbers<[1], [0], [0], [1], [0, 0, 1, 1], [], []>} : vector<8x4xbf16>, vector<4x384xbf16>, vector<8x384xf32> -> vector<8x384xf32>
    %7 = arith.addf %2, %6 : vector<8x384xf32>
    %8 = vector.extract_strided_slice %1 {offsets = [0, 1], sizes = [4, 384], strides = [1, 1]} : vector<4x512xbf16> to vector<4x384xbf16>
    %c1 = arith.constant 1 : index
    %c0_6 = arith.constant 0 : index
    %c0_7 = arith.constant 0 : index
    %9 = vector.load %arg3[%c1, %c0_6, %c0_7] : memref<9x8x4xbf16, #tpu.memory_space<vmem>>, vector<1x8x4xbf16>
    %10 = vector.shape_cast %9 : vector<1x8x4xbf16> to vector<8x4xbf16>
    %cst_8 = arith.constant dense<0.000000e+00> : vector<8x384xf32>
    %11 = tpu.matmul %10, %8, %cst_8 {dimension_numbers = #tpu.dot_dimension_numbers<[1], [0], [0], [1], [0, 0, 1, 1], [], []>} : vector<8x4xbf16>, vector<4x384xbf16>, vector<8x384xf32> -> vector<8x384xf32>
    %12 = arith.addf %7, %11 : vector<8x384xf32>
    %13 = vector.extract_strided_slice %1 {offsets = [0, 2], sizes = [4, 384], strides = [1, 1]} : vector<4x512xbf16> to vector<4x384xbf16>
    %c2 = arith.constant 2 : index
    %c0_9 = arith.constant 0 : index
    %c0_10 = arith.constant 0 : index
    %14 = vector.load %arg3[%c2, %c0_9, %c0_10] : memref<9x8x4xbf16, #tpu.memory_space<vmem>>, vector<1x8x4xbf16>
    %15 = vector.shape_cast %14 : vector<1x8x4xbf16> to vector<8x4xbf16>
    %cst_11 = arith.constant dense<0.000000e+00> : vector<8x384xf32>
    %16 = tpu.matmul %15, %13, %cst_11 {dimension_numbers = #tpu.dot_dimension_numbers<[1], [0], [0], [1], [0, 0, 1, 1], [], []>} : vector<8x4xbf16>, vector<4x384xbf16>, vector<8x384xf32> -> vector<8x384xf32>
    %17 = arith.addf %12, %16 : vector<8x384xf32>
    %18 = vector.extract_strided_slice %1 {offsets = [0, 18], sizes = [4, 384], strides = [1, 1]} : vector<4x512xbf16> to vector<4x384xbf16>
    %c3 = arith.constant 3 : index
    %c0_12 = arith.constant 0 : index
    %c0_13 = arith.constant 0 : index
    %19 = vector.load %arg3[%c3, %c0_12, %c0_13] : memref<9x8x4xbf16, #tpu.memory_space<vmem>>, vector<1x8x4xbf16>
    %20 = vector.shape_cast %19 : vector<1x8x4xbf16> to vector<8x4xbf16>
    %cst_14 = arith.constant dense<0.000000e+00> : vector<8x384xf32>
    %21 = tpu.matmul %20, %18, %cst_14 {dimension_numbers = #tpu.dot_dimension_numbers<[1], [0], [0], [1], [0, 0, 1, 1], [], []>} : vector<8x4xbf16>, vector<4x384xbf16>, vector<8x384xf32> -> vector<8x384xf32>
    %22 = arith.addf %17, %21 : vector<8x384xf32>
    %23 = vector.extract_strided_slice %1 {offsets = [0, 19], sizes = [4, 384], strides = [1, 1]} : vector<4x512xbf16> to vector<4x384xbf16>
    %c4 = arith.constant 4 : index
    %c0_15 = arith.constant 0 : index
    %c0_16 = arith.constant 0 : index
    %24 = vector.load %arg3[%c4, %c0_15, %c0_16] : memref<9x8x4xbf16, #tpu.memory_space<vmem>>, vector<1x8x4xbf16>
    %25 = vector.shape_cast %24 : vector<1x8x4xbf16> to vector<8x4xbf16>
    %cst_17 = arith.constant dense<0.000000e+00> : vector<8x384xf32>
    %26 = tpu.matmul %25, %23, %cst_17 {dimension_numbers = #tpu.dot_dimension_numbers<[1], [0], [0], [1], [0, 0, 1, 1], [], []>} : vector<8x4xbf16>, vector<4x384xbf16>, vector<8x384xf32> -> vector<8x384xf32>
    %27 = arith.addf %22, %26 : vector<8x384xf32>
    %28 = vector.extract_strided_slice %1 {offsets = [0, 20], sizes = [4, 384], strides = [1, 1]} : vector<4x512xbf16> to vector<4x384xbf16>
    %c5 = arith.constant 5 : index
    %c0_18 = arith.constant 0 : index
    %c0_19 = arith.constant 0 : index
    %29 = vector.load %arg3[%c5, %c0_18, %c0_19] : memref<9x8x4xbf16, #tpu.memory_space<vmem>>, vector<1x8x4xbf16>
    %30 = vector.shape_cast %29 : vector<1x8x4xbf16> to vector<8x4xbf16>
    %cst_20 = arith.constant dense<0.000000e+00> : vector<8x384xf32>
    %31 = tpu.matmul %30, %28, %cst_20 {dimension_numbers = #tpu.dot_dimension_numbers<[1], [0], [0], [1], [0, 0, 1, 1], [], []>} : vector<8x4xbf16>, vector<4x384xbf16>, vector<8x384xf32> -> vector<8x384xf32>
    %32 = arith.addf %27, %31 : vector<8x384xf32>
    %33 = vector.extract_strided_slice %1 {offsets = [0, 36], sizes = [4, 384], strides = [1, 1]} : vector<4x512xbf16> to vector<4x384xbf16>
    %c6 = arith.constant 6 : index
    %c0_21 = arith.constant 0 : index
    %c0_22 = arith.constant 0 : index
    %34 = vector.load %arg3[%c6, %c0_21, %c0_22] : memref<9x8x4xbf16, #tpu.memory_space<vmem>>, vector<1x8x4xbf16>
    %35 = vector.shape_cast %34 : vector<1x8x4xbf16> to vector<8x4xbf16>
    %cst_23 = arith.constant dense<0.000000e+00> : vector<8x384xf32>
    %36 = tpu.matmul %35, %33, %cst_23 {dimension_numbers = #tpu.dot_dimension_numbers<[1], [0], [0], [1], [0, 0, 1, 1], [], []>} : vector<8x4xbf16>, vector<4x384xbf16>, vector<8x384xf32> -> vector<8x384xf32>
    %37 = arith.addf %32, %36 : vector<8x384xf32>
    %38 = vector.extract_strided_slice %1 {offsets = [0, 37], sizes = [4, 384], strides = [1, 1]} : vector<4x512xbf16> to vector<4x384xbf16>
    %c7 = arith.constant 7 : index
    %c0_24 = arith.constant 0 : index
    %c0_25 = arith.constant 0 : index
    %39 = vector.load %arg3[%c7, %c0_24, %c0_25] : memref<9x8x4xbf16, #tpu.memory_space<vmem>>, vector<1x8x4xbf16>
    %40 = vector.shape_cast %39 : vector<1x8x4xbf16> to vector<8x4xbf16>
    %cst_26 = arith.constant dense<0.000000e+00> : vector<8x384xf32>
    %41 = tpu.matmul %40, %38, %cst_26 {dimension_numbers = #tpu.dot_dimension_numbers<[1], [0], [0], [1], [0, 0, 1, 1], [], []>} : vector<8x4xbf16>, vector<4x384xbf16>, vector<8x384xf32> -> vector<8x384xf32>
    %42 = arith.addf %37, %41 : vector<8x384xf32>
    %43 = vector.extract_strided_slice %1 {offsets = [0, 38], sizes = [4, 384], strides = [1, 1]} : vector<4x512xbf16> to vector<4x384xbf16>
    %c8 = arith.constant 8 : index
    %c0_27 = arith.constant 0 : index
    %c0_28 = arith.constant 0 : index
    %44 = vector.load %arg3[%c8, %c0_27, %c0_28] : memref<9x8x4xbf16, #tpu.memory_space<vmem>>, vector<1x8x4xbf16>
    %45 = vector.shape_cast %44 : vector<1x8x4xbf16> to vector<8x4xbf16>
    %cst_29 = arith.constant dense<0.000000e+00> : vector<8x384xf32>
    %46 = tpu.matmul %45, %43, %cst_29 {dimension_numbers = #tpu.dot_dimension_numbers<[1], [0], [0], [1], [0, 0, 1, 1], [], []>} : vector<8x4xbf16>, vector<4x384xbf16>, vector<8x384xf32> -> vector<8x384xf32>
    %47 = arith.addf %42, %46 : vector<8x384xf32>
    %c0_30 = arith.constant 0 : index
    %c0_31 = arith.constant 0 : index
    %48 = vector.load %arg4[%c0_30, %c0_31] : memref<1x384xf32, #tpu.memory_space<vmem>>, vector<1x384xf32>
    %49 = vector.broadcast %48 : vector<1x384xf32> to vector<8x384xf32>
    %50 = arith.mulf %47, %49 : vector<8x384xf32>
    %cst_32 = arith.constant dense<0.000000e+00> : vector<8xf32>
    %51 = vector.multi_reduction <add>, %50, %cst_32 [1] : vector<8x384xf32> to vector<8xf32>
    %52 = vector.shape_cast %51 : vector<8xf32> to vector<8x1xf32>
    %cst_33 = arith.constant 3.906250e-03 : f32
    %53 = vector.broadcast %cst_33 : f32 to vector<8x1xf32>
    %54 = arith.mulf %52, %53 : vector<8x1xf32>
    %55 = arith.mulf %47, %47 : vector<8x384xf32>
    %56 = vector.broadcast %48 : vector<1x384xf32> to vector<8x384xf32>
    %57 = arith.mulf %55, %56 : vector<8x384xf32>
    %cst_34 = arith.constant dense<0.000000e+00> : vector<8xf32>
    %58 = vector.multi_reduction <add>, %57, %cst_34 [1] : vector<8x384xf32> to vector<8xf32>
    %59 = vector.shape_cast %58 : vector<8xf32> to vector<8x1xf32>
    %cst_35 = arith.constant 3.906250e-03 : f32
    %60 = vector.broadcast %cst_35 : f32 to vector<8x1xf32>
    %61 = arith.mulf %59, %60 : vector<8x1xf32>
    %62 = arith.mulf %54, %54 : vector<8x1xf32>
    %63 = arith.subf %61, %62 : vector<8x1xf32>
    %cst_36 = arith.constant 0.000000e+00 : f32
    %64 = vector.broadcast %cst_36 : f32 to vector<8x1xf32>
    %65 = arith.maximumf %63, %64 : vector<8x1xf32>
    %66 = vector.broadcast %54 : vector<8x1xf32> to vector<8x384xf32>
    %67 = arith.subf %47, %66 : vector<8x384xf32>
    %cst_37 = arith.constant 9.99999974E-6 : f32
    %68 = vector.broadcast %cst_37 : f32 to vector<8x1xf32>
    %69 = arith.addf %65, %68 : vector<8x1xf32>
    %70 = math.rsqrt %69 : vector<8x1xf32>
    %71 = vector.broadcast %70 : vector<8x1xf32> to vector<8x384xf32>
    %72 = arith.mulf %67, %71 : vector<8x384xf32>
    %cst_38 = arith.constant 0.000000e+00 : f32
    %73 = vector.broadcast %cst_38 : f32 to vector<8x384xf32>
    %74 = arith.maximumf %72, %73 : vector<8x384xf32>
    %c0_39 = arith.constant 0 : index
    %c0_40 = arith.constant 0 : index
    %c0_41 = arith.constant 0 : index
    %75 = vector.load %arg5[%c0_39, %c0_40, %c0_41] : memref<1x8x384xf32, #tpu.memory_space<vmem>>, vector<1x8x384xf32>
    %76 = vector.shape_cast %75 : vector<1x8x384xf32> to vector<8x384xf32>
    %77 = vector.shape_cast %74 : vector<8x384xf32> to vector<1x8x384xf32>
    tpu.vector_store %arg5[%c0_39, %c0_40, %c0_41], %77 {strides = array<i32>} : memref<1x8x384xf32, #tpu.memory_space<vmem>>, vector<1x8x384xf32>,
    return
  }
  func.func @transform_0(%arg0: i32, %arg1: i32) -> (i32, i32, i32) {
    %c0_i32 = arith.constant 0 : i32
    %c0_i32_0 = arith.constant 0 : i32
    %c0_i32_1 = arith.constant 0 : i32
    return %arg0, %c0_i32, %c0_i32_0 : i32, i32, i32
  }
  func.func @transform_1(%arg0: i32, %arg1: i32) -> (i32, i32, i32) {
    %c0_i32 = arith.constant 0 : i32
    %c0_i32_0 = arith.constant 0 : i32
    %c0_i32_1 = arith.constant 0 : i32
    return %c0_i32, %arg1, %c0_i32_0 : i32, i32, i32
  }
  func.func @transform_2(%arg0: i32, %arg1: i32) -> (i32, i32) {
    %c0_i32 = arith.constant 0 : i32
    %c0_i32_0 = arith.constant 0 : i32
    %c0_i32_1 = arith.constant 0 : i32
    return %c0_i32, %c0_i32_0 : i32, i32
  }
  func.func @transform_3(%arg0: i32, %arg1: i32) -> (i32, i32, i32) {
    %c0_i32 = arith.constant 0 : i32
    %c0_i32_0 = arith.constant 0 : i32
    return %arg0, %arg1, %c0_i32 : i32, i32, i32
  }
}

</mosaic_0001>

<bundles_post_ra>
// kernel: tpu_custom_call.1
= control target key start
LH: loop header
LB: loop body
LE: loop exit
PB: predicated region body
PF: predicated region fallthrough
CT: control target
= control target key end

     0   :  { %8 = vsyncpa [#allocation3], 0  ;;  %s1466_s0 = inlined_call_operand.vmem [shape: bf16[2,4,512], index: 0, kind: input, shape index: {}]   ;;  %s1467_s1 = inlined_call_operand.vmem [shape: bf16[9,8,4], index: 1, kind: input, shape index: {}]   ;;  %s1468_s2 = inlined_call_operand.vmem [shape: f32[1,384], index: 2, kind: input, shape index: {}]   ;;  %s1469_s3 = inlined_call_operand.hbm [shape: f32[2,8,384], index: 3, kind: output, shape index: {}]  }
   0x1   :  { %10 = vsyncpa [#allocation3 + $0x1], 0  ;;  %s1250_s12 = smov 0   ;;  %s1252_s13 = smov 0  }
   0x2   :  { %s1254_s14 = smov 0   ;;  %s1256_s15 = smov 0  }
   0x3   :  { %s1258_s16 = smov 0   ;;  %s1260_s17 = smov 0  }
   0x4 LB: > { %s1028_s18 = sadd.s32 4294967295, %s1220_s17   ;;  %s1029_s19 = sadd.s32 4294967294, %s1220_s17   ;;  %s1220_s17 = sphi %s1260_s17, %s16_s17   ;;  %s1216_s16 = sphi %s1258_s16, %s1476_s16   ;;  %s1212_s15 = sphi %s1256_s15, %s1475_s15   ;;  %s1208_s14 = sphi %s1254_s14, %s1474_s14   ;;  %s1204_s13 = sphi %s1252_s13, %s1473_s13   ;;  %s1200_s12 = sphi %s1250_s12, %s1472_s12  }
   0x5   : > { %s28_s20 = sadd.s32 1, %s1216_s16  ;;  %s110_s21 = sadd.s32 1, %s1208_s14 }
   0x6   : > { %p30_p0 = scmp.ge.s32.totalorder %s28_s20, 2  ;;  %p120_p1 = scmp.ne.s32.totalorder %s1208_s14, %s1204_s13 }
   0x7   : > { %p121_p2 = scmp.eq.s32.totalorder %s1028_s18, 1  ;;  %p126_p3 = scmp.ne.s32.totalorder %s1204_s13, %s1200_s12 }
   0x8   : > { %s1478_s20 = smov (%p30_p0, %s28_s20), 0  ;;  %p127_p5 = scmp.eq.s32.totalorder %s1029_s19, 1 }
   0x9   : > { %p1290_p4 = por %p121_p2, %p120_p1  ;;  %s105_s23 = ssub.s32 %s1216_s16, %s1478_s20 }
   0xa   : > { %p1033_p6 = scmp.ge.s32.totalorder %s1220_s17, 1  ;;  %p108_p7 = scmp.eq.s32.totalorder %s105_s23, 0 }
   0xb   : > { %p1297_p8 = por %p127_p5, %p126_p3  ;;  %p163_p9 = scmp.lt.s32.totalorder %s1220_s17, 3 }
   0xc   : > { %s1303_s25 = scalar_select %p108_p7, %s1208_s14, %s110_s21  }
   0xd   : > { %p164_p10 = pnand %p1033_p6, %p163_p9 }
   0xe   : > { %p191_p11 = scmp.lt.s32.totalorder (!%p164_p10), %s1212_s15, 1  ;;  %s1222_s4 = smov (!%p164_p10), 127  }
   0xf   : > { %167 = sbr.rel (%p164_p10) target bundleno = 551 (0x227), region = 32  ;;  %s1223_s5 = smov (!%p164_p10), 126  }
  0x10   : > { %s1224_s6 = smov (!%p164_p10), 110   ;;  %s1225_s7 = smov (!%p164_p10), 109  }
  0x11   : > { %s1226_s8 = smov (!%p164_p10), 108   ;;  %s1227_s9 = smov (!%p164_p10), 92  }
  0x12   : > { %s1228_s10 = smov (!%p164_p10), 91   ;;  %s1229_s11 = smov (!%p164_p10), 90  }
  0x13   : > { %s188_s23 = sand.u32 (!%p164_p10), 1, %s1204_s13  }
  0x14   : > { %s192_s26 = scalar_select %p191_p11, %s1212_s15, 1  ;;  %vm231_vm0 = vcmask 1041408   ;;  %v202_v37 = vld [vmem:[%s1467_s1] sm:$0xf]  ;;  %vm227_vm1 = vcmask 31744   ;;  %vm351_vm2 = vcmask 1031168  }
  0x15   : > { %vm223_vm3 = vcmask 1039360   ;;  %v1036_v54 = vld [vmem:[%s1467_s1 + $0x4] sm:$0xf]  ;;  %vm428_vm4 = vcmask 900096   ;;  %v1043_v61 = vld [vmem:[%s1467_s1 + $0x8] sm:$0xf] }
  0x16   : > { %s1074_s27 = sshll.u32 %s192_s26, 3  ;;  %vm505_vm5 = vcmask 891904   ;;  %vm582_vm6 = vcmask 883712   ;;  %vm659_vm7 = vcmask 752640   ;;  %vm736_vm8 = vcmask 744448   ;;  %s1075_s26 = smul.u32 24, %s188_s23 }
  0x17   : > { %s195_s30 = scalar_lea.vmem %s1466_s0, %s1074_s27  ;;  %vm813_vm9 = vcmask 736256   ;;  %s1076_s27 = smul.u32 24, %s1212_s15 }
  0x18   : > { %v1310_v0 = vld [vmem:[%s195_s30] sm:$0xff] }
  0x19   : > { %206 = vst [vmem:[#allocation1] ss:$4 sm:$0xff] %v1310_v0  ;;  %s938_s30 = scalar_lea.hbm %s1469_s3, %s1076_s27 }
  0x1a   : > { %s942_s15 = sshll.u32 %s938_s30, 4  ;;  %s943_s15 = int_to_ptr.hbm [resolvable:$true] %s942_s15 }
  0x20   : > { %v211_v1 = vld.sshfl [vmem:[#allocation1 + $0x10] sm:$0xff pattern:$0x73625140]  ;;  %v207_v2 = vld.sshfl [vmem:[#allocation1] sm:$0xff pattern:$0x73625140] }
  0x21   : > { %219 = vrot.lane.b32.xlu0 %v211_v1, %s1222_s4  ;;  %215 = vrot.lane.b32.xlu1 %v207_v2, %s1222_s4  ;;  %v213_v3 = vld.sshfl [vmem:[#allocation1 + $0x18] sm:$0xff pattern:$0x73625140]  ;;  %v209_v4 = vld.sshfl [vmem:[#allocation1 + $0x8] sm:$0xff pattern:$0x73625140] }
  0x22   : > { %280 = vst [vmem:[#allocation1] ss:$4 sm:$0xff] %v1310_v0 }
  0x29   : > { %221 = vrot.lane.b32.xlu0 %v213_v3, %s1222_s4  ;;  %217 = vrot.lane.b32.xlu1 %v209_v4, %s1222_s4  ;;  %v1314_v5 = vld.sshfl [vmem:[#allocation1] sm:$0xff pattern:$0x73625140]  ;;  %v1316_v6 = vld.sshfl [vmem:[#allocation1 + $0x8] sm:$0xff pattern:$0x73625140] }
  0x2a   : > { %v1318_v7 = vld.sshfl [vmem:[#allocation1 + $0x10] sm:$0xff pattern:$0x73625140]  ;;  %v287_v34 = vsel %vm231_vm0, %v1314_v5, 0  ;;  %v289_v45 = vsel %vm231_vm0, %v1316_v6, 0  ;;  %s190_s4 = scalar_lea.vmem [#allocation2], %s1075_s26 }
  0x2b   : > { %334 = vst [vmem:[#allocation1] ss:$4 sm:$0xff] %v1310_v0  ;;  %300 = vmatpush.bf16.msra.mxu3 %v287_v34  ;;  %v291_v49 = vsel %vm231_vm0, %v1318_v7, 0 }
  0x2e   : > { %1040 = vmatmul.msk.bf16.vlgmr.msra.gmra.mxu3 %vm227_vm1, %v202_v37 }
  0x32   : > { %v337_v8 = vld.sshfl [vmem:[#allocation1 + $0x8] sm:$0xff pattern:$0x73625140]  ;;  %v339_v9 = vld.sshfl [vmem:[#allocation1 + $0x10] sm:$0xff pattern:$0x73625140] }
  0x33   : > { %347 = vrot.lane.b32.xlu0 %v339_v9, %s1223_s5  ;;  %v335_v10 = vld.sshfl [vmem:[#allocation1] sm:$0xff pattern:$0x73625140]  ;;  %v341_v11 = vld.sshfl [vmem:[#allocation1 + $0x18] sm:$0xff pattern:$0x73625140] }
  0x34   : > { %343 = vrot.lane.b32.xlu2 %v335_v10, %s1223_s5  ;;  %411 = vst [vmem:[#allocation1] ss:$4 sm:$0xff] %v1310_v0 }
  0x3b   : > { %349 = vrot.lane.b32.xlu0 %v341_v11, %s1223_s5  ;;  %v414_v12 = vld.sshfl [vmem:[#allocation1 + $0x8] sm:$0xff pattern:$0x73625140]  ;;  %v416_v13 = vld.sshfl [vmem:[#allocation1 + $0x10] sm:$0xff pattern:$0x73625140] }
  0x3c   : > { %v418_v14 = vld.sshfl [vmem:[#allocation1 + $0x18] sm:$0xff pattern:$0x73625140]  ;;  %422 = vrot.lane.b32.xlu1 %v414_v12, %s1224_s6  ;;  %345 = vrot.lane.b32.xlu2 %v337_v8, %s1223_s5  ;;  %v412_v15 = vld.sshfl [vmem:[#allocation1] sm:$0xff pattern:$0x73625140] }
  0x3d   : > { %488 = vst [vmem:[#allocation1] ss:$4 sm:$0xff] %v1310_v0  ;;  %v1047_v11 = vld [vmem:[%s1467_s1 + $0xc] sm:$0xf]  ;;  %s940_s5 = sshll.u32 %s190_s4, 4  ;;  %s941_s5 = int_to_ptr.vmem [resolvable:$true] %s940_s5 }
  0x44   : > { %420 = vrot.lane.b32.xlu1 %v412_v15, %s1224_s6  ;;  %v493_v16 = vld.sshfl [vmem:[#allocation1 + $0x10] sm:$0xff pattern:$0x73625140]  ;;  %v489_v17 = vld.sshfl [vmem:[#allocation1] sm:$0xff pattern:$0x73625140]  ;;  %424 = vrot.lane.b32.xlu2 %v416_v13, %s1224_s6 }
  0x45   : > { %501 = vrot.lane.b32.xlu0 %v493_v16, %s1225_s7  ;;  %v495_v18 = vld.sshfl [vmem:[#allocation1 + $0x18] sm:$0xff pattern:$0x73625140]  ;;  %v491_v19 = vld.sshfl [vmem:[#allocation1 + $0x8] sm:$0xff pattern:$0x73625140] }
  0x46   : > { %565 = vst [vmem:[#allocation1] ss:$4 sm:$0xff] %v1310_v0 }
  0x4c   : > { %503 = vrot.lane.b32.xlu1 %v495_v18, %s1225_s7  ;;  %426 = vrot.lane.b32.xlu2 %v418_v14, %s1224_s6  ;;  %s925_s6 = scalar_lea.sflag [#allocation3], %s188_s23 }
  0x4d   : > { %499 = vrot.lane.b32.xlu0 %v491_v19, %s1225_s7  ;;  %v568_v20 = vld.sshfl [vmem:[#allocation1 + $0x8] sm:$0xff pattern:$0x73625140]  ;;  %v570_v21 = vld.sshfl [vmem:[#allocation1 + $0x10] sm:$0xff pattern:$0x73625140] }
  0x4e   : > { %v572_v22 = vld.sshfl [vmem:[#allocation1 + $0x18] sm:$0xff pattern:$0x73625140]  ;;  %v566_v23 = vld.sshfl [vmem:[#allocation1] sm:$0xff pattern:$0x73625140] }
  0x4f   : > { %642 = vst [vmem:[#allocation1] ss:$4 sm:$0xff] %v1310_v0 }
  0x54   : > { %574 = vrot.lane.b32.xlu1 %v566_v23, %s1226_s8  ;;  %497 = vrot.lane.b32.xlu2 %v489_v17, %s1225_s7  ;;  %s1156_s7 = sshra.s32 %s943_s15, 4  ;;  %s1157_s7 = int_to_ptr.hbm [resolvable:$true] %s1156_s7 }
  0x55   : > { %p1163_p1 = scmp.lt.s32.totalorder %s1157_s7, %s1469_s3 }
  0x56   : > { %v649_v24 = vld.sshfl [vmem:[#allocation1 + $0x18] sm:$0xff pattern:$0x73625140]  ;;  %v643_v25 = vld.sshfl [vmem:[#allocation1] sm:$0xff pattern:$0x73625140] }
  0x57   : > { %651 = vrot.lane.b32.xlu0 %v643_v25, %s1227_s9  ;;  %v645_v26 = vld.sshfl [vmem:[#allocation1 + $0x8] sm:$0xff pattern:$0x73625140]  ;;  %v647_v27 = vld.sshfl [vmem:[#allocation1 + $0x10] sm:$0xff pattern:$0x73625140] }
  0x58   : > { %719 = vst [vmem:[#allocation1] ss:$4 sm:$0xff] %v1310_v0 }
  0x5c   : > { %653 = vrot.lane.b32.xlu1 %v645_v26, %s1227_s9  ;;  %576 = vrot.lane.b32.xlu2 %v568_v20, %s1226_s8 }
  0x5f   : > { %580 = vrot.lane.b32.xlu0 %v572_v22, %s1226_s8  ;;  %v720_v28 = vld.sshfl [vmem:[#allocation1] sm:$0xff pattern:$0x73625140]  ;;  %v722_v29 = vld.sshfl [vmem:[#allocation1 + $0x8] sm:$0xff pattern:$0x73625140] }
  0x60   : > { %v724_v30 = vld.sshfl [vmem:[#allocation1 + $0x10] sm:$0xff pattern:$0x73625140]  ;;  %v726_v31 = vld.sshfl [vmem:[#allocation1 + $0x18] sm:$0xff pattern:$0x73625140] }
  0x61   : > { %796 = vst [vmem:[#allocation1] ss:$4 sm:$0xff] %v1310_v0 }
  0x64   : > { %655 = vrot.lane.b32.xlu1 %v647_v27, %s1227_s9  ;;  %578 = vrot.lane.b32.xlu2 %v570_v21, %s1226_s8  ;;  %s1158_s8 = scalar_lea.hbm %s1157_s7, 24 }
  0x65   : > { %p1159_p12 = scmp.ne.s32.totalorder %s1157_s7, %s1158_s8 }
  0x67   : > { %732 = vrot.lane.b32.xlu0 %v724_v30, %s1228_s10  ;;  %v1051_v30 = vld [vmem:[%s1467_s1 + $0x10] sm:$0xf]  ;;  %p1160_p13 = pnand %p1159_p12, %p1290_p4 }
  0x68   : > { %v801_v32 = vld.sshfl [vmem:[#allocation1 + $0x10] sm:$0xff pattern:$0x73625140]  ;;  %v797_v33 = vld.sshfl [vmem:[#allocation1] sm:$0xff pattern:$0x73625140] }
  0x69   : > { %v799_v35 = vld.sshfl [vmem:[#allocation1 + $0x8] sm:$0xff pattern:$0x73625140]  ;;  %v803_v36 = vld.sshfl [vmem:[#allocation1 + $0x18] sm:$0xff pattern:$0x73625140]  ;;  %p1161_p0 = pneg %p1160_p13 }
  0x6c   : > { %657 = vrot.lane.b32.xlu1 %v649_v24, %s1227_s9  ;;  %730 = vrot.lane.b32.xlu2 %v722_v29, %s1228_s10 }
  0x6f   : > { %734 = vrot.lane.b32.xlu0 %v726_v31, %s1228_s10 }
  0x74   : > { %809 = vrot.lane.b32.xlu1 %v801_v32, %s1229_s11  ;;  %728 = vrot.lane.b32.xlu2 %v720_v28, %s1228_s10  ;;  %v1055_v28 = vld [vmem:[%s1467_s1 + $0x14] sm:$0xf] }
  0x77   : > { %805 = vrot.lane.b32.xlu0 %v797_v33, %s1229_s11 }
  0x7c   : > { %807 = vrot.lane.b32.xlu1 %v799_v35, %s1229_s11  ;;  %811 = vrot.lane.b32.xlu2 %v803_v36, %s1229_s11  ;;  %s1162_s11 = scalar_lea.hbm %s1469_s3, 48 }
  0x7d   : > { %p1164_p2 = scmp.lt.s32.totalorder %s1162_s11, %s1158_s8 }
  0x7f   : > { %p1165_p3 = por %p1164_p2, %p1163_p1 }
  0x81   : > { %p1166_p5 = pnand %p1165_p3, %p1161_p0 }
  0x8e   : > { %v344_v38 = vpop.permute.xlu2 %343 }
  0x93   : > { %v220_v39 = vpop.permute.xlu0 %219  ;;  %v216_v40 = vpop.permute.xlu1 %215 }
  0x96   : > { %v346_v41 = vpop.permute.xlu2 %345 }
  0x97   : > { %v352_v42 = vsel %vm351_vm2, %v344_v38, %v346_v41 }
  0x98   : > { %v359_v53 = vsel %vm231_vm0, %v352_v42, 0 }
  0x9b   : > { %v222_v43 = vpop.permute.xlu0 %221  ;;  %v218_v44 = vpop.permute.xlu1 %217 }
  0x9c   : > { %v224_v46 = vsel %vm223_vm3, %v216_v40, %v218_v44  ;;  %v225_v47 = vsel %vm223_vm3, %v218_v44, %v220_v39  ;;  %v226_v48 = vsel %vm223_vm3, %v220_v39, %v222_v43  ;;  %v1059_v43 = vld [vmem:[%s1467_s1 + $0x18] sm:$0xf] }
  0x9d   : > { %v233_v50 = vsel %vm231_vm0, %v224_v46, 0  ;;  %v236_v51 = vsel %vm231_vm0, %v225_v47, 0  ;;  %v239_v52 = vsel %vm231_vm0, %v226_v48, 0 }
  0x9e   : > { %248 = vmatpush.bf16.msra.mxu0 %v233_v50  ;;  %261 = vmatpush.bf16.msra.mxu1 %v236_v51  ;;  %v425_v55 = vpop.permute.xlu2 %424 }
  0x9f   : > { %274 = vmatpush.bf16.msra.mxu2 %v239_v52 }
  0xa1   : > { %1037 = vmatmul.msk.bf16.vlgmr.msra.gmra.mxu0 %vm227_vm1, %v1036_v54  ;;  %1038 = vmatmul.msk.bf16.vlgmr.msra.gmra.mxu1 %vm227_vm1, %v1036_v54 }
  0xa2   : > { %313 = vmatpush.bf16.msrb.mxu0 %v289_v45  ;;  %326 = vmatpush.bf16.msrb.mxu1 %v291_v49 }
  0xa3   : > { %374 = vmatpush.bf16.msrb.mxu2 %v359_v53 }
  0xa4   : > { %1039 = vmatmul.msk.bf16.vlgmr.msra.gmra.mxu2 %vm227_vm1, %v1036_v54 }
  0xa5   : > { %v348_v56 = vpop.permute.xlu0 %347 }
  0xa6   : > { %v353_v57 = vsel %vm351_vm2, %v346_v41, %v348_v56  ;;  %v427_v58 = vpop.permute.xlu2 %426 }
  0xa7   : > { %v362_v59 = vsel %vm231_vm0, %v353_v57, 0  ;;  %v431_v60 = vsel %vm428_vm4, %v425_v55, %v427_v58 }
  0xa8   : > { %387 = vmatpush.bf16.msrb.mxu3 %v362_v59  ;;  %v442_v62 = vsel %vm231_vm0, %v431_v60, 0 }
  0xab   : > { %1045 = vmatmul.msk.bf16.vlgmr.msrb.gmra.mxu3 %vm227_vm1, %v1043_v61 }
  0xac   : > { %477 = vmatpush.bf16.msra.mxu3 %v442_v62 }
  0xad   : > { %v350_v63 = vpop.permute.xlu0 %349 }
  0xae   : > { %v354_v0 = vsel %vm351_vm2, %v348_v56, %v350_v63  ;;  %v423_v1 = vpop.permute.xlu1 %422  ;;  %v498_v2 = vpop.permute.xlu2 %497  ;;  %v1063_v56 = vld [vmem:[%s1467_s1 + $0x1c] sm:$0xf]  ;;  %v1067_v63 = vld [vmem:[%s1467_s1 + $0x20] sm:$0xf] }
  0xaf   : > { %v365_v3 = vsel %vm231_vm0, %v354_v0, 0  ;;  %v430_v4 = vsel %vm428_vm4, %v423_v1, %v425_v55 }
  0xb0   : > { %v439_v5 = vsel %vm231_vm0, %v430_v4, 0  ;;  %400 = vmatpush.bf16.msra.mxu0 %v365_v3 }
  0xb1   : > { %464 = vmatpush.bf16.msra.mxu2 %v439_v5  ;;  %1041 = vmatmul.msk.bf16.vlgmr.msrb.gmra.mxu0 %vm227_vm1, %v202_v37  ;;  %v302_v0 = vpop.f32.mrf.mxu3 }
  0xb2   : > { %1042 = vmatmul.msk.bf16.vlgmr.msrb.gmra.mxu1 %vm227_vm1, %v202_v37 }
  0xb4   : > { %1044 = vmatmul.msk.bf16.vlgmr.msrb.gmra.mxu2 %vm227_vm1, %v1043_v61 }
  0xb6   : > { %v421_v6 = vpop.permute.xlu1 %420  ;;  %v577_v7 = vpop.permute.xlu2 %576 }
  0xb7   : > { %v429_v8 = vsel %vm428_vm4, %v421_v6, %v423_v1  ;;  %v502_v9 = vpop.permute.xlu0 %501 }
  0xb8   : > { %v436_v10 = vsel %vm231_vm0, %v429_v8, 0 }
  0xb9   : > { %451 = vmatpush.bf16.msra.mxu1 %v436_v10  ;;  %v304_v1 = vpop.f32.mrf.mxu3 }
  0xbb   : > { %1050 = vmatmul.msk.bf16.vlgmr.msra.gmra.mxu3 %vm227_vm1, %v1047_v11 }
  0xbe   : > { %v504_v12 = vpop.permute.xlu1 %503  ;;  %v579_v13 = vpop.permute.xlu2 %578 }
  0xbf   : > { %v508_v14 = vsel %vm505_vm5, %v502_v9, %v504_v12  ;;  %v500_v15 = vpop.permute.xlu0 %499  ;;  %v584_v16 = vsel %vm582_vm6, %v577_v7, %v579_v13 }
  0xc0   : > { %v519_v17 = vsel %vm231_vm0, %v508_v14, 0  ;;  %v507_v18 = vsel %vm505_vm5, %v500_v15, %v502_v9  ;;  %v506_v19 = vsel %vm505_vm5, %v498_v2, %v500_v15  ;;  %v593_v22 = vsel %vm231_vm0, %v584_v16, 0 }
  0xc1   : > { %v516_v20 = vsel %vm231_vm0, %v507_v18, 0  ;;  %v513_v21 = vsel %vm231_vm0, %v506_v19, 0  ;;  %554 = vmatpush.bf16.msrb.mxu2 %v519_v17  ;;  %1046 = vmatmul.msk.bf16.vlgmr.msra.gmra.mxu0 %vm227_vm1, %v1043_v61 }
  0xc2   : > { %541 = vmatpush.bf16.msrb.mxu1 %v516_v20  ;;  %528 = vmatpush.bf16.msrb.mxu0 %v513_v21 }
  0xc3   : > { %1048 = vmatmul.msk.bf16.vlgmr.msra.gmra.mxu1 %vm227_vm1, %v1047_v11 }
  0xc4   : > { %1049 = vmatmul.msk.bf16.vlgmr.msra.gmra.mxu2 %vm227_vm1, %v1047_v11 }
  0xc6   : > { %618 = vmatpush.bf16.msra.mxu0 %v593_v22  ;;  %v575_v23 = vpop.permute.xlu1 %574  ;;  %v731_v24 = vpop.permute.xlu2 %730 }
  0xc7   : > { %v583_v25 = vsel %vm582_vm6, %v575_v23, %v577_v7 }
  0xc8   : > { %v590_v26 = vsel %vm231_vm0, %v583_v25, 0 }
  0xc9   : > { %v652_v27 = vpop.permute.xlu0 %651  ;;  %605 = vmatpush.bf16.msrb.mxu3 %v590_v26 }
  0xcc   : > { %1056 = vmatmul.msk.bf16.vlgmr.msrb.gmra.mxu3 %vm227_vm1, %v1055_v28 }
  0xce   : > { %v654_v29 = vpop.permute.xlu1 %653  ;;  %v729_v31 = vpop.permute.xlu2 %728 }
  0xcf   : > { %v660_v32 = vsel %vm659_vm7, %v652_v27, %v654_v29  ;;  %v737_v33 = vsel %vm736_vm8, %v729_v31, %v731_v24 }
  0xd0   : > { %v667_v34 = vsel %vm231_vm0, %v660_v32, 0  ;;  %v744_v37 = vsel %vm231_vm0, %v737_v33, 0 }
  0xd1   : > { %682 = vmatpush.bf16.msra.mxu2 %v667_v34  ;;  %v581_v35 = vpop.permute.xlu0 %580  ;;  %1052 = vmatmul.msk.bf16.vlgmr.msrb.gmra.mxu0 %vm227_vm1, %v1051_v30 }
  0xd2   : > { %v585_v36 = vsel %vm582_vm6, %v579_v13, %v581_v35 }
  0xd3   : > { %v596_v38 = vsel %vm231_vm0, %v585_v36, 0  ;;  %1053 = vmatmul.msk.bf16.vlgmr.msrb.gmra.mxu1 %vm227_vm1, %v1051_v30 }
  0xd4   : > { %1054 = vmatmul.msk.bf16.vlgmr.msrb.gmra.mxu2 %vm227_vm1, %v1051_v30  ;;  %631 = vmatpush.bf16.msra.mxu1 %v596_v38 }
  0xd6   : > { %v656_v39 = vpop.permute.xlu1 %655  ;;  %v812_v52 = vpop.permute.xlu2 %811 }
  0xd7   : > { %v661_v40 = vsel %vm659_vm7, %v654_v29, %v656_v39 }
  0xd8   : > { %759 = vmatpush.bf16.msrb.mxu1 %v744_v37  ;;  %v670_v41 = vsel %vm231_vm0, %v661_v40, 0 }
  0xd9   : > { %695 = vmatpush.bf16.msra.mxu3 %v670_v41  ;;  %v733_v42 = vpop.permute.xlu0 %732 }
  0xda   : > { %v738_v44 = vsel %vm736_vm8, %v731_v24, %v733_v42 }
  0xdb   : > { %v747_v45 = vsel %vm231_vm0, %v738_v44, 0 }
  0xdc   : > { %1061 = vmatmul.msk.bf16.vlgmr.msra.gmra.mxu3 %vm227_vm1, %v1059_v43  ;;  %772 = vmatpush.bf16.msrb.mxu2 %v747_v45 }
  0xde   : > { %v658_v46 = vpop.permute.xlu1 %657 }
  0xdf   : > { %v662_v47 = vsel %vm659_vm7, %v656_v39, %v658_v46 }
  0xe0   : > { %v673_v48 = vsel %vm231_vm0, %v662_v47, 0 }
  0xe1   : > { %708 = vmatpush.bf16.msrb.mxu0 %v673_v48  ;;  %v735_v49 = vpop.permute.xlu0 %734 }
  0xe2   : > { %v739_v50 = vsel %vm736_vm8, %v733_v42, %v735_v49  ;;  %1057 = vmatmul.msk.bf16.vlgmr.msra.gmra.mxu0 %vm227_vm1, %v1055_v28 }
  0xe3   : > { %v750_v51 = vsel %vm231_vm0, %v739_v50, 0  ;;  %1058 = vmatmul.msk.bf16.vlgmr.msra.gmra.mxu1 %vm227_vm1, %v1055_v28 }
  0xe4   : > { %1060 = vmatmul.msk.bf16.vlgmr.msra.gmra.mxu2 %vm227_vm1, %v1059_v43  ;;  %785 = vmatpush.bf16.msrb.mxu3 %v750_v51 }
  0xe6   : > { %v810_v53 = vpop.permute.xlu1 %809 }
  0xe7   : > { %v816_v54 = vsel %vm813_vm9, %v810_v53, %v812_v52 }
  0xe8   : > { %v827_v55 = vsel %vm231_vm0, %v816_v54, 0 }
  0xe9   : > { %862 = vmatpush.bf16.msra.mxu2 %v827_v55  ;;  %v806_v57 = vpop.permute.xlu0 %805 }
  0xec   : > { %1066 = vmatmul.msk.bf16.vlgmr.msrb.gmra.mxu3 %vm227_vm1, %v1063_v56 }
  0xee   : > { %v808_v58 = vpop.permute.xlu1 %807 }
  0xef   : > { %v815_v59 = vsel %vm813_vm9, %v808_v58, %v810_v53  ;;  %v814_v60 = vsel %vm813_vm9, %v806_v57, %v808_v58 }
  0xf0   : > { %v824_v61 = vsel %vm231_vm0, %v815_v59, 0  ;;  %v821_v62 = vsel %vm231_vm0, %v814_v60, 0 }
  0xf1   : > { %849 = vmatpush.bf16.msra.mxu1 %v824_v61  ;;  %836 = vmatpush.bf16.msra.mxu0 %v821_v62 }
  0xf2   : > { %1062 = vmatmul.msk.bf16.vlgmr.msrb.gmra.mxu0 %vm227_vm1, %v1059_v43 }
  0xf3   : > { %1064 = vmatmul.msk.bf16.vlgmr.msrb.gmra.mxu1 %vm227_vm1, %v1063_v56 }
  0xf4   : > { %1065 = vmatmul.msk.bf16.vlgmr.msrb.gmra.mxu2 %vm227_vm1, %v1063_v56 }
 0x102   : > { %1068 = vmatmul.msk.bf16.vlgmr.msra.gmra.mxu0 %vm227_vm1, %v1067_v63 }
 0x103   : > { %1069 = vmatmul.msk.bf16.vlgmr.msra.gmra.mxu1 %vm227_vm1, %v1067_v63 }
 0x104   : > { %1070 = vmatmul.msk.bf16.vlgmr.msra.gmra.mxu2 %vm227_vm1, %v1067_v63 }
 0x11e   : > { %v250_v2 = vpop.f32.mrf.mxu0  ;;  %v263_v3 = vpop.f32.mrf.mxu1 }
 0x11f   : > { %v303_v4 = vadd.f32 %v302_v0, %v250_v2  ;;  %v871_v0 = vld [vmem:[%s1468_s2] sm:$0x7] }
 0x126   : > { %v252_v6 = vpop.f32.mrf.mxu0  ;;  %v265_v7 = vpop.f32.mrf.mxu1 }
 0x127   : > { %v276_v5 = vpop.f32.mrf.mxu2  ;;  %v873_v7 = vperm.slane %v871_v0, 0 }
 0x12e   : > { %v315_v9 = vpop.f32.mrf.mxu0  ;;  %v389_v10 = vpop.f32.mrf.mxu3 }
 0x12f   : > { %v278_v8 = vpop.f32.mrf.mxu2  ;;  %v316_v11 = vadd.f32 %v315_v9, %v263_v3  ;;  %v328_v12 = vpop.f32.mrf.mxu1  ;;  %v874_v9 = vperm.slane %v871_v0, 1 }
 0x130   : > { %v329_v13 = vadd.f32 %v328_v12, %v276_v5 }
 0x131   : > { %v407_v14 = vadd.f32 %v389_v10, %v316_v11 }
 0x136   : > { %v317_v17 = vpop.f32.mrf.mxu0  ;;  %v391_v18 = vpop.f32.mrf.mxu3 }
 0x137   : > { %v376_v15 = vpop.f32.mrf.mxu2  ;;  %v330_v19 = vpop.f32.mrf.mxu1 }
 0x138   : > { %v406_v16 = vadd.f32 %v376_v15, %v303_v4 }
 0x13e   : > { %v402_v21 = vpop.f32.mrf.mxu0  ;;  %v479_v22 = vpop.f32.mrf.mxu3 }
 0x13f   : > { %v378_v20 = vpop.f32.mrf.mxu2  ;;  %v408_v51 = vadd.f32 %v402_v21, %v329_v13 }
 0x140   : > { %v453_v23 = vpop.f32.mrf.mxu1 }
 0x141   : > { %v483_v48 = vadd.f32 %v453_v23, %v406_v16  ;;  %v485_v58 = vadd.f32 %v479_v22, %v408_v51  ;;  %v875_v16 = vperm.slane %v871_v0, 2 }
 0x146   : > { %v404_v25 = vpop.f32.mrf.mxu0  ;;  %v481_v26 = vpop.f32.mrf.mxu3 }
 0x147   : > { %v466_v24 = vpop.f32.mrf.mxu2 }
 0x148   : > { %v455_v27 = vpop.f32.mrf.mxu1  ;;  %v484_v49 = vadd.f32 %v466_v24, %v407_v14 }
 0x14e   : > { %v530_v29 = vpop.f32.mrf.mxu0 }
 0x14f   : > { %v468_v28 = vpop.f32.mrf.mxu2  ;;  %v607_v30 = vpop.f32.mrf.mxu3  ;;  %v560_v52 = vadd.f32 %v530_v29, %v483_v48 }
 0x150   : > { %v543_v31 = vpop.f32.mrf.mxu1 }
 0x151   : > { %v561_v53 = vadd.f32 %v543_v31, %v484_v49  ;;  %v637_v59 = vadd.f32 %v607_v30, %v560_v52 }
 0x156   : > { %v532_v33 = vpop.f32.mrf.mxu0 }
 0x157   : > { %v556_v32 = vpop.f32.mrf.mxu2  ;;  %v609_v34 = vpop.f32.mrf.mxu3 }
 0x158   : > { %v545_v35 = vpop.f32.mrf.mxu1  ;;  %v562_v60 = vadd.f32 %v556_v32, %v485_v58 }
 0x15f   : > { %v558_v36 = vpop.f32.mrf.mxu2  ;;  %v620_v37 = vpop.f32.mrf.mxu0 }
 0x160   : > { %v697_v38 = vpop.f32.mrf.mxu3  ;;  %v633_v39 = vpop.f32.mrf.mxu1  ;;  %v638_v57 = vadd.f32 %v620_v37, %v561_v53 }
 0x161   : > { %v639_v1 = vadd.f32 %v633_v39, %v562_v60 }
 0x162   : > { %v715_v62 = vadd.f32 %v697_v38, %v638_v57 }
 0x167   : > { %v684_v40 = vpop.f32.mrf.mxu2  ;;  %v622_v41 = vpop.f32.mrf.mxu0 }
 0x168   : > { %v699_v42 = vpop.f32.mrf.mxu3  ;;  %v635_v43 = vpop.f32.mrf.mxu1  ;;  %v714_v61 = vadd.f32 %v684_v40, %v637_v59 }
 0x16f   : > { %v686_v44 = vpop.f32.mrf.mxu2  ;;  %v710_v45 = vpop.f32.mrf.mxu0 }
 0x170   : > { %v787_v46 = vpop.f32.mrf.mxu3  ;;  %v761_v47 = vpop.f32.mrf.mxu1  ;;  %v716_v5 = vadd.f32 %v710_v45, %v639_v1 }
 0x171   : > { %v791_v2 = vadd.f32 %v761_v47, %v714_v61 }
 0x172   : > { %v793_v13 = vadd.f32 %v787_v46, %v716_v5 }
 0x177   : > { %v774_v50 = vpop.f32.mrf.mxu2  ;;  %v712_v54 = vpop.f32.mrf.mxu0 }
 0x178   : > { %v789_v55 = vpop.f32.mrf.mxu3  ;;  %v763_v56 = vpop.f32.mrf.mxu1  ;;  %v792_v3 = vadd.f32 %v774_v50, %v715_v62 }
 0x17f   : > { %v776_v63 = vpop.f32.mrf.mxu2  ;;  %v838_v4 = vpop.f32.mrf.mxu0 }
 0x180   : > { %v868_v6 = vadd.f32 %v838_v4, %v791_v2  ;;  %v851_v8 = vpop.f32.mrf.mxu1 }
 0x181   : > { %v869_v10 = vadd.f32 %v851_v8, %v792_v3 }
 0x182   : > { %v887_v11 = vmul.f32 %v868_v6, %v868_v6  ;;  %v879_v14 = vmul.f32 %v873_v7, %v868_v6 }
 0x183   : > { %v888_v12 = vmul.f32 %v869_v10, %v869_v10  ;;  %v880_v15 = vmul.f32 %v874_v9, %v869_v10 }
 0x184   : > { %v890_v19 = vmul.f32 %v887_v11, %v873_v7 }
 0x185   : > { %v891_v20 = vmul.f32 %v888_v12, %v874_v9  ;;  %v882_v25 = vadd.f32 %v880_v15, %v879_v14 }
 0x187   : > { %v864_v17 = vpop.f32.mrf.mxu2  ;;  %v840_v21 = vpop.f32.mrf.mxu0  ;;  %v893_v28 = vadd.f32 %v891_v20, %v890_v19 }
 0x188   : > { %v870_v18 = vadd.f32 %v864_v17, %v793_v13  ;;  %v853_v23 = vpop.f32.mrf.mxu1 }
 0x18a   : > { %v889_v22 = vmul.f32 %v870_v18, %v870_v18  ;;  %v881_v24 = vmul.f32 %v875_v16, %v870_v18 }
 0x18c   : > { %v883_v26 = vadd.f32 %v882_v25, %v881_v24  ;;  %v892_v27 = vmul.f32 %v889_v22, %v875_v16 }
 0x18e   : > { %884 = vadd.xlane.f32.xlu2 %v883_v26  ;;  %v894_v29 = vadd.f32 %v893_v28, %v892_v27 }
 0x18f   : > { %v866_v30 = vpop.f32.mrf.mxu2 }
 0x190   : > { %895 = vadd.xlane.f32.xlu0 %v894_v29 }
 0x201   : > { %v885_v31 = vpop.xlane.xlu2 %884 }
 0x202   : > { %v886_v32 = vmul.f32 0.00390625, %v885_v31 }
 0x203   : > { %v896_v33 = vpop.xlane.xlu0 %895 }
 0x204   : > { %v897_v34 = vmul.f32 0.00390625, %v896_v33  ;;  %v898_v35 = vmul.f32 %v886_v32, %v886_v32  ;;  %v901_v45 = vsub.f32 %v868_v6, %v886_v32  ;;  %v902_v46 = vsub.f32 %v869_v10, %v886_v32 }
 0x205   : > { %v903_v47 = vsub.f32 %v870_v18, %v886_v32 }
 0x206   : > { %v899_v36 = vsub.f32 %v897_v34, %v898_v35 }
 0x208   : > { %v900_v37 = vmax.f32 %v899_v36, 0.0 }
 0x20a   : > { %v904_v38 = vadd.f32 1e-05, %v900_v37 }
 0x20c   : > { %1140 = vrsqrt.f32 %v904_v38  ;;  %vm911_vm11 = vweird.f32 %v904_v38 }
 0x212   : > { %v1141_v39 = vpop.eup %1140 }
 0x213   : > { %v906_v40 = vmul.f32 %v1141_v39, %v904_v38  ;;  %vm912_vm10 = vweird.f32 %v1141_v39 }
 0x214   : > { %vm913_vm12 = vmor %vm911_vm11, %vm912_vm10 }
 0x215   : > { %v907_v41 = vmul.f32 %v1141_v39, %v906_v40 }
 0x217   : > { %v908_v42 = vmul.f32 0.5, %v907_v41 }
 0x219   : > { %v909_v43 = vsub.f32 1.5, %v908_v42 }
 0x21b   : > { %v910_v44 = vmul.f32 %v1141_v39, %v909_v43 }
 0x21d   : > { %v914_v48 = vsel %vm913_vm12, %v1141_v39, %v910_v44 }
 0x21e   : > { %v915_v49 = vmul.f32 %v914_v48, %v901_v45  ;;  %v916_v50 = vmul.f32 %v914_v48, %v902_v46  ;;  %v917_v51 = vmul.f32 %v914_v48, %v903_v47 }
 0x220   : > { %v918_v52 = vmax.f32 %v915_v49, 0.0  ;;  %v919_v53 = vmax.f32 %v916_v50, 0.0  ;;  %v920_v54 = vmax.f32 %v917_v51, 0.0 }
 0x222   : > { %921 = vst [vmem:[%s190_s4] sm:$0xff] %v918_v52 }
 0x223   : > { %922 = vst [vmem:[%s190_s4 + $0x8] sm:$0xff] %v919_v53 }
 0x224   : > { %923 = vst [vmem:[%s190_s4 + $0x10] sm:$0xff] %v920_v54 }
 0x225   : > { %1169 = shalt.err (!%p1166_p5)
}
 0x226   : > { %1077 = dma.vmem_to_hbm [thread:$0]  (%p1290_p4), %s941_s5, 384, %s943_s15, %s925_s6  }
 0x227 PF: > { %p1083_p6 = scmp.ge.s32.totalorder %s1220_s17, 2  ;;  %s954_s21 = sand.u32 1, %s1200_s12  }
 0x228   : > { %s955_s23 = scalar_lea.sflag [#allocation3], %s954_s21 }
 0x229   : > { %p1080_p7 = pnand %p1083_p6, %p1297_p8 }
 0x22b   : > { %p1081_p9 = pneg %p1080_p7 }
 0x22d   : > { %1195 = dma.done.wait (%p1081_p9), %s955_s23, 384  }
 0x22e   : > { %1197 = vsyncadd (%p1081_p9), %s955_s23, 4294966912  ;;  %s16_s17 = sadd.s32 1, %s1220_s17   ;;  %s1472_s12 = smov %s1204_s13 }
 0x22f   : > { %p13_p10 = scmp.ge.s32.totalorder %s16_s17, 4   ;;  %s1473_s13 = smov %s1208_s14 }
 0x230   : > { %s1474_s14 = smov %s1303_s25  ;;  %s1475_s15 = smov %s1216_s16 }
 0x231   : > { %s1476_s16 = smov %s1478_s20  ;;  %15 = sbr.rel (!%p13_p10) target bundleno = 4 (0x4), region = 78 }
 0x236   :  { %961 = vsyncpa [#allocation3], 1 }
 0x237   :  { %963 = vsyncpa [#allocation3 + $0x1], 1 }

</bundles_post_ra>
